<compile_context>
chip_gen: v6e
topology: v6e:2x2x1
jax: 0.10.0
libtpu: 0.0.40
codegen_flags: <defaults>
</compile_context>

<pallas_src>
import functools

import jax
import jax.numpy as jnp
from jax import lax
from jax.experimental import pallas as pl
from jax.experimental.pallas import tpu as pltpu


LANES = 128


def _dice_kernel(p_ref, t_ref, loss_ref, acc_num, acc_den, *,
                 smooth, p_pow, rows_total, tile_rows, needs_mask):
    """Grid = (N, num_row_tiles); one step handles a (tile_rows, 128) chunk."""
    k = pl.program_id(1)
    nk = pl.num_programs(1)

    @pl.when(k == 0)
    def _():
        acc_num[...] = jnp.zeros_like(acc_num)
        acc_den[...] = jnp.zeros_like(acc_den)

    pred = p_ref[...].astype(jnp.float32)      # (tile_rows, 128)
    targ = t_ref[...].astype(jnp.float32)

    prod = pred * targ
    if p_pow == 1:                              # common Dice variant: no power
        den_t = pred + targ
    elif p_pow == 2:                            # default: plain VALU multiplies
        den_t = pred * pred + targ * targ
    else:                                       # general p -> EUP path
        den_t = (jnp.power(pred, jnp.float32(p_pow)) +
                 jnp.power(targ, jnp.float32(p_pow)))

    if needs_mask:
        # Last tile along the reduction axis may read past the array; zero the
        # out-of-range rows (masking after the power keeps any p correct).
        rows_left = rows_total - k * tile_rows
        m = lax.broadcasted_iota(jnp.int32, (tile_rows, LANES), 0) < rows_left
        prod = jnp.where(m, prod, 0.0)
        den_t = jnp.where(m, den_t, 0.0)

    # Full-tile f32 accumulators: pure VALU adds per step; the single
    # cross-lane reduction happens once per sample in the epilogue.
    acc_num[...] += prod
    acc_den[...] += den_t

    @pl.when(k == nk - 1)
    def _():
        num = (jnp.sum(acc_num[...], axis=(0, 1), keepdims=True)
               + jnp.float32(smooth))
        den = (jnp.sum(acc_den[...], axis=(0, 1), keepdims=True)
               + jnp.float32(smooth))
        loss_ref[...] = (1.0 - num / den).reshape(1, 1, 1).astype(loss_ref.dtype)


def binary_dice_loss(predict, target, *, smooth=1.0, p=2, reduction="mean",
                     tile_rows=2048):
    assert predict.shape[0] == target.shape[0], \
        "predict & target batch size don't match"

    n = predict.shape[0]
    pred2 = predict.reshape(n, -1)
    targ2 = target.reshape(n, -1)
    d = pred2.shape[1]

    # Pack the feature dim into [N, T, 128] (lane-dense, sublane-dense).
    t = pl.cdiv(d, LANES)
    if d != t * LANES:
        # TODO(synk): only the rare D % 128 != 0 case pays this pad pass; the
        # zero padding is neutral for p > 0 (true for the usual p=1 / p=2).
        pad = t * LANES - d
        pred2 = jnp.pad(pred2, ((0, 0), (0, pad)))
        targ2 = jnp.pad(targ2, ((0, 0), (0, pad)))
    pred3 = pred2.reshape(n, t, LANES)
    targ3 = targ2.reshape(n, t, LANES)

    # Tile the reduction (sublane) axis.  A full-dim tile is always legal; for
    # large T use ~`tile_rows` sublanes (~1 MiB f32 per input tile), rounded to
    # the sublane packing granularity of the narrowest input dtype.  Budget:
    # 2 inputs x 2 buffers x tile + 2 f32 accumulators stays well inside the
    # default scoped VMEM on v5e/v6e/v7x.
    if t <= tile_rows:
        ts = t
        needs_mask = False
    else:
        pack = max(4 // jnp.dtype(predict.dtype).itemsize,
                   4 // jnp.dtype(target.dtype).itemsize, 1)
        gran = 8 * pack
        ts = max(gran, (tile_rows // gran) * gran)
        needs_mask = (t % ts) != 0
    nk = pl.cdiv(t, ts)

    kernel = functools.partial(
        _dice_kernel, smooth=float(smooth), p_pow=p,
        rows_total=t, tile_rows=ts, needs_mask=needs_mask)

    per_sample = pl.pallas_call(
        kernel,
        out_shape=jax.ShapeDtypeStruct((n, 1, 1), jnp.float32),
        grid_spec=pltpu.PrefetchScalarGridSpec(
            num_scalar_prefetch=0,
            grid=(n, nk),                        # batch parallel, reduce last
            in_specs=[
                pl.BlockSpec((None, ts, LANES), lambda i, k: (i, k, 0)),
                pl.BlockSpec((None, ts, LANES), lambda i, k: (i, k, 0)),
            ],
            out_specs=pl.BlockSpec((1, 1, 1), lambda i, k: (i, 0, 0)),
            scratch_shapes=[
                pltpu.VMEM((ts, LANES), jnp.float32),
                pltpu.VMEM((ts, LANES), jnp.float32),
            ],
        ),
        compiler_params=pltpu.CompilerParams(
            dimension_semantics=("parallel", "arbitrary"),
            vmem_limit_bytes=32 * 1024 * 1024,
        ),
    )(pred3, targ3)

    loss = per_sample[:, 0, 0]                   # shape [N]

    if reduction == "mean":
        return jnp.mean(loss)
    elif reduction == "sum":
        return jnp.sum(loss)
    elif reduction == "none":
        return loss
    else:
        raise Exception("Unexpected reduction {}".format(reduction))


def _reference(predict, target, smooth=1.0, p=2, reduction="mean"):
    n = predict.shape[0]
    pr = predict.reshape(n, -1).astype(jnp.float32)
    tg = target.reshape(n, -1).astype(jnp.float32)
    num = jnp.sum(pr * tg, axis=1) + smooth
    den = jnp.sum(pr ** p + tg ** p, axis=1) + smooth
    loss = 1.0 - num / den
    if reduction == "mean":
        return loss.mean()
    elif reduction == "sum":
        return loss.sum()
    return loss


if __name__ == "__main__":
    key = jax.random.PRNGKey(0)
    k1, k2, k3, k4 = jax.random.split(key, 4)

    # Test 1: [N, C, H, W] = [2, 4, 16, 16]; f32 predict, bf16 binary target
    # (bf16 target halves its HBM traffic; 0/1 values are exact in bf16).
    predict = jax.nn.sigmoid(jax.random.normal(k1, (2, 4, 16, 16), jnp.float32))
    target = (jax.random.uniform(k2, (2, 4, 16, 16)) > 0.5).astype(jnp.bfloat16)

    out = jax.block_until_ready(
        binary_dice_loss(predict, target, smooth=1.0, p=2, reduction="mean"))
    ref = _reference(predict, target, smooth=1.0, p=2, reduction="mean")
    assert jnp.allclose(out, ref, atol=1e-5, rtol=1e-5), (out, ref)

    # Test 2: flat [N, D] input with a ragged reduction tile (exercises the
    # in-kernel tail mask) and reduction='none'.
    p2 = jax.nn.sigmoid(jax.random.normal(k3, (3, 1536), jnp.float32))
    t2 = (jax.random.uniform(k4, (3, 1536)) > 0.5).astype(jnp.float32)
    out2 = jax.block_until_ready(
        binary_dice_loss(p2, t2, smooth=1.0, p=2, reduction="none", tile_rows=8))
    ref2 = _reference(p2, t2, smooth=1.0, p=2, reduction="none")
    assert jnp.allclose(out2, ref2, atol=1e-5, rtol=1e-5), (out2, ref2)

    # Test 3: p=1 fast path, sum reduction, D % 128 != 0 (pad path).
    p3 = jax.nn.sigmoid(jax.random.normal(k1, (2, 200), jnp.float32))
    t3 = (jax.random.uniform(k2, (2, 200)) > 0.5).astype(jnp.float32)
    out3 = jax.block_until_ready(
        binary_dice_loss(p3, t3, smooth=1.0, p=1, reduction="sum"))
    ref3 = _reference(p3, t3, smooth=1.0, p=1, reduction="sum")
    assert jnp.allclose(out3, ref3, atol=1e-5, rtol=1e-5), (out3, ref3)

    print("KERNEL_OK")
</pallas_src>

<mosaic_0001>
module attributes {stable_mosaic.version = 11 : i64} {
  func.func @_dice_kernel(%arg0: i32, %arg1: i32, %arg2: memref<1x8x128xf32, #tpu.memory_space<vmem>>, %arg3: memref<1x8x128xbf16, #tpu.memory_space<vmem>>, %arg4: memref<1x1x1xf32, #tpu.memory_space<vmem>>, %arg5: memref<8x128xf32, #tpu.memory_space<vmem>>, %arg6: memref<8x128xf32, #tpu.memory_space<vmem>>) attributes {dimension_semantics = [#tpu.dimension_semantics<parallel>, #tpu.dimension_semantics<arbitrary>], iteration_bounds = array<i64: 2, 1>, scalar_prefetch = 0 : i64, scratch_operands = 2 : i64, tpu.core_type = #tpu.core_type<tc>, window_params = [{transform_indices = @transform_0, window_bounds = array<i64: 1, 8, 128>}, {transform_indices = @transform_1, window_bounds = array<i64: 1, 8, 128>}, {transform_indices = @transform_2, window_bounds = array<i64: 1, 1, 1>}]} {
    %c0_i32 = arith.constant 0 : i32
    %0 = arith.cmpi eq, %arg1, %c0_i32 : i32
    %1 = arith.extui %0 : i1 to i32
    %c0_i32_0 = arith.constant 0 : i32
    %2 = arith.cmpi ne, %1, %c0_i32_0 : i32
    scf.if %2 {
      %cst = arith.constant 0.000000e+00 : f32
      %21 = vector.broadcast %cst : f32 to vector<8x128xf32>
      %c0_16 = arith.constant 0 : index
      %c0_17 = arith.constant 0 : index
      %22 = vector.load %arg5[%c0_16, %c0_17] : memref<8x128xf32, #tpu.memory_space<vmem>>, vector<8x128xf32>
      tpu.vector_store %arg5[%c0_16, %c0_17], %21 {strides = array<i32>} : memref<8x128xf32, #tpu.memory_space<vmem>>, vector<8x128xf32>,
      %cst_18 = arith.constant 0.000000e+00 : f32
      %23 = vector.broadcast %cst_18 : f32 to vector<8x128xf32>
      %c0_19 = arith.constant 0 : index
      %c0_20 = arith.constant 0 : index
      %24 = vector.load %arg6[%c0_19, %c0_20] : memref<8x128xf32, #tpu.memory_space<vmem>>, vector<8x128xf32>
      tpu.vector_store %arg6[%c0_19, %c0_20], %23 {strides = array<i32>} : memref<8x128xf32, #tpu.memory_space<vmem>>, vector<8x128xf32>,
    } else {
    }
    %c0 = arith.constant 0 : index
    %c0_1 = arith.constant 0 : index
    %c0_2 = arith.constant 0 : index
    %3 = vector.load %arg2[%c0, %c0_1, %c0_2] : memref<1x8x128xf32, #tpu.memory_space<vmem>>, vector<1x8x128xf32>
    %4 = vector.shape_cast %3 : vector<1x8x128xf32> to vector<8x128xf32>
    %c0_3 = arith.constant 0 : index
    %c0_4 = arith.constant 0 : index
    %c0_5 = arith.constant 0 : index
    %5 = vector.load %arg3[%c0_3, %c0_4, %c0_5] : memref<1x8x128xbf16, #tpu.memory_space<vmem>>, vector<1x8x128xbf16>
    %6 = vector.shape_cast %5 : vector<1x8x128xbf16> to vector<8x128xbf16>
    %7 = arith.extf %6 : vector<8x128xbf16> to vector<8x128xf32>
    %8 = arith.mulf %4, %7 : vector<8x128xf32>
    %9 = arith.mulf %4, %4 : vector<8x128xf32>
    %10 = arith.mulf %7, %7 : vector<8x128xf32>
    %11 = arith.addf %9, %10 : vector<8x128xf32>
    %c0_6 = arith.constant 0 : index
    %c0_7 = arith.constant 0 : index
    %12 = vector.load %arg5[%c0_6, %c0_7] : memref<8x128xf32, #tpu.memory_space<vmem>>, vector<8x128xf32>
    %13 = arith.addf %12, %8 : vector<8x128xf32>
    %c0_8 = arith.constant 0 : index
    %c0_9 = arith.constant 0 : index
    %14 = vector.load %arg5[%c0_8, %c0_9] : memref<8x128xf32, #tpu.memory_space<vmem>>, vector<8x128xf32>
    tpu.vector_store %arg5[%c0_8, %c0_9], %13 {strides = array<i32>} : memref<8x128xf32, #tpu.memory_space<vmem>>, vector<8x128xf32>,
    %c0_10 = arith.constant 0 : index
    %c0_11 = arith.constant 0 : index
    %15 = vector.load %arg6[%c0_10, %c0_11] : memref<8x128xf32, #tpu.memory_space<vmem>>, vector<8x128xf32>
    %16 = arith.addf %15, %11 : vector<8x128xf32>
    %c0_12 = arith.constant 0 : index
    %c0_13 = arith.constant 0 : index
    %17 = vector.load %arg6[%c0_12, %c0_13] : memref<8x128xf32, #tpu.memory_space<vmem>>, vector<8x128xf32>
    tpu.vector_store %arg6[%c0_12, %c0_13], %16 {strides = array<i32>} : memref<8x128xf32, #tpu.memory_space<vmem>>, vector<8x128xf32>,
    %c0_i32_14 = arith.constant 0 : i32
    %18 = arith.cmpi eq, %arg1, %c0_i32_14 : i32
    %19 = arith.extui %18 : i1 to i32
    %c0_i32_15 = arith.constant 0 : i32
    %20 = arith.cmpi ne, %19, %c0_i32_15 : i32
    scf.if %20 {
      %c0_16 = arith.constant 0 : index
      %c0_17 = arith.constant 0 : index
      %21 = vector.load %arg5[%c0_16, %c0_17] : memref<8x128xf32, #tpu.memory_space<vmem>>, vector<8x128xf32>
      %22 = vector.shape_cast %21 : vector<8x128xf32> to vector<1x8x128xf32>
      %cst = arith.constant dense<0.000000e+00> : vector<1xf32>
      %23 = vector.multi_reduction <add>, %22, %cst [1, 2] : vector<1x8x128xf32> to vector<1xf32>
      %24 = vector.shape_cast %23 : vector<1xf32> to vector<1x1x1xf32>
      %25 = vector.extract %24[0, 0, 0] : f32 from vector<1x1x1xf32>
      %26 = vector.broadcast %25 : f32 to vector<1x1xf32>
      %cst_18 = arith.constant 1.000000e+00 : f32
      %27 = vector.broadcast %cst_18 : f32 to vector<1x1xf32>
      %28 = arith.addf %26, %27 : vector<1x1xf32>
      %c0_19 = arith.constant 0 : index
      %c0_20 = arith.constant 0 : index
      %29 = vector.load %arg6[%c0_19, %c0_20] : memref<8x128xf32, #tpu.memory_space<vmem>>, vector<8x128xf32>
      %30 = vector.shape_cast %29 : vector<8x128xf32> to vector<1x8x128xf32>
      %cst_21 = arith.constant dense<0.000000e+00> : vector<1xf32>
      %31 = vector.multi_reduction <add>, %30, %cst_21 [1, 2] : vector<1x8x128xf32> to vector<1xf32>
      %32 = vector.shape_cast %31 : vector<1xf32> to vector<1x1x1xf32>
      %33 = vector.extract %32[0, 0, 0] : f32 from vector<1x1x1xf32>
      %34 = vector.broadcast %33 : f32 to vector<1x1xf32>
      %cst_22 = arith.constant 1.000000e+00 : f32
      %35 = vector.broadcast %cst_22 : f32 to vector<1x1xf32>
      %36 = arith.addf %34, %35 : vector<1x1xf32>
      %37 = arith.divf %28, %36 : vector<1x1xf32>
      %cst_23 = arith.constant 1.000000e+00 : f32
      %38 = vector.broadcast %cst_23 : f32 to vector<1x1xf32>
      %39 = arith.subf %38, %37 : vector<1x1xf32>
      %40 = vector.shape_cast %39 : vector<1x1xf32> to vector<1x1x1xf32>
      %c0_24 = arith.constant 0 : index
      %c0_25 = arith.constant 0 : index
      %c0_26 = arith.constant 0 : index
      %41 = vector.load %arg4[%c0_24, %c0_25, %c0_26] : memref<1x1x1xf32, #tpu.memory_space<vmem>>, vector<1x1x1xf32>
      tpu.vector_store %arg4[%c0_24, %c0_25, %c0_26], %40 {strides = array<i32>} : memref<1x1x1xf32, #tpu.memory_space<vmem>>, vector<1x1x1xf32>,
    } else {
    }
    return
  }
  func.func @transform_0(%arg0: i32, %arg1: i32) -> (i32, i32, i32) {
    %c0_i32 = arith.constant 0 : i32
    %c0_i32_0 = arith.constant 0 : i32
    return %arg0, %arg1, %c0_i32 : i32, i32, i32
  }
  func.func @transform_1(%arg0: i32, %arg1: i32) -> (i32, i32, i32) {
    %c0_i32 = arith.constant 0 : i32
    %c0_i32_0 = arith.constant 0 : i32
    return %arg0, %arg1, %c0_i32 : i32, i32, i32
  }
  func.func @transform_2(%arg0: i32, %arg1: i32) -> (i32, i32, i32) {
    %c0_i32 = arith.constant 0 : i32
    %c0_i32_0 = arith.constant 0 : i32
    %c0_i32_1 = arith.constant 0 : i32
    return %arg0, %c0_i32, %c0_i32_0 : i32, i32, i32
  }
}

</mosaic_0001>

<bundles_post_ra>
// kernel: tpu_custom_call.1
= control target key start
LH: loop header
LB: loop body
LE: loop exit
PB: predicated region body
PF: predicated region fallthrough
CT: control target
= control target key end

     0   :  { %7 = vsyncpa [#allocation5], 0  ;;  %s691_s0 = inlined_call_operand.hbm [shape: f32[2,8,128], index: 0, kind: input, shape index: {}]   ;;  %s692_s1 = inlined_call_operand.hbm [shape: bf16[2,8,128], index: 1, kind: input, shape index: {}]   ;;  %s693_s2 = inlined_call_operand.vmem [shape: f32[2,1,1], index: 2, kind: output, shape index: {}]  }
   0x1   :  { %9 = vsyncpa [#allocation5 + $0x1], 0 }
   0x2   :  { %10 = vsyncpa [#allocation7], 0 }
   0x3   :  { %12 = vsyncpa [#allocation7 + $0x1], 0  ;;  %s563_s9 = smov 0   ;;  %s565_s10 = smov 0  }
   0x4   :  { %s567_s11 = smov 0   ;;  %s569_s12 = smov 0  }
   0x5   :  { %s571_s13 = smov 0   ;;  %s573_s14 = smov 0  }
   0x6 LB: > { %s355_s15 = sadd.s32 4294967295, %s544_s14   ;;  %s30_s16 = sadd.s32 1, %s540_s13  ;;  %s544_s14 = sphi %s573_s14, %s18_s14   ;;  %s540_s13 = sphi %s571_s13, %s702_s13   ;;  %s536_s12 = sphi %s569_s12, %s701_s12   ;;  %s532_s11 = sphi %s567_s11, %s700_s11   ;;  %s528_s10 = sphi %s565_s10, %s699_s10   ;;  %s524_s9 = sphi %s563_s9, %s698_s9  }
   0x7   : > { %p32_p0 = scmp.ge.s32.totalorder %s30_s16, 2  ;;  %s39_s17 = sadd.s32 1, %s532_s11 }
   0x8   : > { %p46_p1 = scmp.ne.s32.totalorder %s532_s11, %s528_s10  ;;  %p47_p2 = scmp.eq.s32.totalorder %s544_s14, 0 }
   0x9   : > { %s704_s16 = smov (%p32_p0, %s30_s16), 0  ;;  %p52_p4 = scmp.ne.s32.totalorder %s528_s10, %s524_s9 }
   0xa   : > { %p599_p3 = por %p47_p2, %p46_p1  ;;  %s34_s19 = ssub.s32 %s540_s13, %s704_s16 }
   0xb   : > { %p53_p5 = scmp.eq.s32.totalorder %s355_s15, 0  ;;  %p37_p6 = scmp.eq.s32.totalorder %s34_s19, 0 }
   0xc   : > { %p383_p8 = scmp.lt.s32.totalorder %s544_s14, 2  ;;  %s615_s22 = sand.u32 1, %s532_s11  }
   0xd   : > { %p606_p7 = por %p53_p5, %p52_p4  ;;  %s360_s23 = sshll.u32 %s540_s13, 7 }
   0xe   : > { %s612_s21 = scalar_select %p37_p6, %s532_s11, %s39_s17  }
   0xf   : > { %s359_s24 = sshll.u32 %s615_s22, 3  ;;  %s140_s27 = scalar_lea.hbm %s691_s0, %s360_s23 }
  0x10   : > { %s134_s28 = scalar_lea.vmem [#allocation4], %s359_s24  ;;  %p624_p9 = pnand %p383_p8, %p599_p3 }
  0x11   : > { %s142_s29 = sshll.u32 %s134_s28, 4  ;;  %p363_p10 = scmp.ge.s32.totalorder %s544_s14, 1  ;;  %s143_s29 = int_to_ptr.vmem [resolvable:$true] %s142_s29 }
  0x12   : > { %p166_p11 = scmp.lt.s32.totalorder %s544_s14, 3  ;;  %s131_s3 = scalar_lea.sflag [#allocation5], %s615_s22 }
  0x13   : > { %p436_p12 = pneg %p624_p9  ;;  %s447_s4 = scalar_lea.vmem %s143_s29, 128 }
  0x14   : > { %p448_p13 = scmp.ne.s32.totalorder %s143_s29, %s447_s4  ;;  %s546_s5 = smov [#allocation4]  }
  0x15   : > { %s452_s6 = sshll.u32 %s546_s5, 4  ;;  %s453_s6 = int_to_ptr.vmem [resolvable:$false] %s452_s6 }
  0x16   : > { %p450_p0 = pnand %p448_p13, %p436_p12  ;;  %s454_s7 = scalar_lea.vmem %s453_s6, 256 }
  0x17   : > { %p455_p2 = scmp.lt.s32.totalorder %s143_s29, %s453_s6  ;;  %p456_p3 = scmp.lt.s32.totalorder %s454_s7, %s447_s4 }
  0x18   : > { %p451_p1 = pneg %p450_p0 }
  0x19   : > { %p457_p4 = por %p456_p3, %p455_p2 }
  0x1b   : > { %p458_p5 = pnand %p457_p4, %p451_p1 }
  0x1d   : > { %461 = shalt.err (!%p458_p5)
}
  0x1e   : > { %379 = dma.hbm_to_vmem [thread:$0]  (!%p624_p9), %s140_s27, 128, %s143_s29, %s131_s3  }
  0x1f   : > { %p642_p6 = pnand %p363_p10, %p166_p11  ;;  %s361_s9 = sshll.u32 %s615_s22, 2 }
  0x20   : > { %s362_s15 = sshll.u32 %s540_s13, 6  ;;  %s153_s23 = scalar_lea.vmem [#allocation6], %s361_s9 }
  0x21   : > { %s159_s19 = scalar_lea.hbm %s692_s1, %s362_s15  ;;  %s161_s24 = sshll.u32 %s153_s23, 4  ;;  %s162_s24 = int_to_ptr.vmem [resolvable:$true] %s161_s24 }
  0x22   : > { %s150_s25 = scalar_lea.sflag [#allocation7], %s615_s22  ;;  %s475_s26 = scalar_lea.vmem %s162_s24, 64 }
  0x23   : > { %p476_p8 = scmp.ne.s32.totalorder %s162_s24, %s475_s26  ;;  %s547_s27 = smov [#allocation6]  }
  0x24   : > { %s480_s28 = sshll.u32 %s547_s27, 4  ;;  %s481_s28 = int_to_ptr.vmem [resolvable:$false] %s480_s28 }
  0x25   : > { %p478_p13 = pnand %p476_p8, %p436_p12  ;;  %s482_s29 = scalar_lea.vmem %s481_s28, 128 }
  0x26   : > { %p483_p10 = scmp.lt.s32.totalorder %s162_s24, %s481_s28  ;;  %p484_p11 = scmp.lt.s32.totalorder %s482_s29, %s475_s26 }
  0x27   : > { %p479_p0 = pneg %p478_p13 }
  0x28   : > { %p485_p1 = por %p484_p11, %p483_p10 }
  0x2a   : > { %p486_p2 = pnand %p485_p1, %p479_p0 }
  0x2c   : > { %489 = shalt.err (!%p486_p2)
}
  0x2d   : > { %382 = dma.hbm_to_vmem [thread:$0]  (!%p624_p9), %s159_s19, 64, %s162_s24, %s150_s25  }
  0x2e   : > { %170 = sbr.rel (%p642_p6) target bundleno = 286 (0x11e), region = 28  ;;  %s172_s22 = sand.u32 (!%p642_p6), 1, %s528_s10  }
  0x2f   : > { %s364_s3 = sshll.u32 (!%p642_p6), %s172_s22, 3  ;;  %s173_s4 = scalar_lea.sflag (!%p642_p6), [#allocation5], %s172_s22 }
  0x30   : > { %s176_s5 = scalar_lea.vmem (!%p642_p6), [#allocation4], %s364_s3 }
  0x33   : > { %515 = dma.done.wait (%p606_p7), %s173_s4, 128  }
  0x34   : > { %517 = vsyncadd (%p606_p7), %s173_s4, 4294967168  ;;  %s365_s6 = sshll.u32 %s172_s22, 2  ;;  %s182_s7 = scalar_lea.sflag [#allocation7], %s172_s22 }
  0x35   : > { %s185_s9 = scalar_lea.vmem [#allocation6], %s365_s6 }
  0x36   : > { %519 = dma.done.wait (%p606_p7), %s182_s7, 64  }
  0x37   : > { %521 = vsyncadd (%p606_p7), %s182_s7, 4294967232  ;;  %v218_v0 = vld [vmem:[%s176_s5] sm:$0xff]  ;;  %v219_v1 = vld [vmem:[%s185_s9] sm:$0xf]  ;;  %p209_p7 = scmp.lt.s32.totalorder %s536_s12, 1  ;;  %vm261_vm0 = vcmask 0  }
  0x38   : > { %v220_v2 = vunpack.c.l.bf16 %v219_v1  ;;  %v222_v3 = vmul.f32 %v218_v0, %v218_v0 }
  0x39   : > { %s706_s12 = smov (!%p209_p7, %s536_s12), 1 }
  0x3a   : > { %v221_v4 = vmul.f32 %v220_v2, %v218_v0  ;;  %v223_v5 = vmul.f32 %v220_v2, %v220_v2  ;;  %s211_s17 = scalar_lea.vmem %s693_s2, %s706_s12 }
  0x3c   : > { %235 = vadd.xlane.f32.xlu0 %v221_v4  ;;  %v224_v6 = vadd.f32 %v223_v5, %v222_v3 }
  0x40   : > { %247 = vadd.xlane.f32.xlu0 %v224_v6 }
  0xc5   : > { %v236_v7 = vpop.xlane.xlu0 %235 }
  0xc6   : > { %v237_v8 = vrot.slane %v236_v7, 4 }
  0xc8   : > { %v238_v9 = vadd.f32 %v237_v8, %v236_v7 }
  0xc9   : > { %v248_v10 = vpop.xlane.xlu0 %247 }
  0xca   : > { %v239_v11 = vrot.slane %v238_v9, 2  ;;  %v249_v12 = vrot.slane %v248_v10, 4 }
  0xcc   : > { %v250_v13 = vadd.f32 %v249_v12, %v248_v10  ;;  %v240_v14 = vadd.f32 %v239_v11, %v238_v9 }
  0xce   : > { %v251_v15 = vrot.slane %v250_v13, 2  ;;  %v241_v16 = vrot.slane %v240_v14, 1 }
  0xd0   : > { %v252_v17 = vadd.f32 %v251_v15, %v250_v13  ;;  %v242_v18 = vadd.f32 %v241_v16, %v240_v14 }
  0xd2   : > { %368 = vpush %v242_v18  ;;  %v253_v19 = vrot.slane %v252_v17, 1 }
  0xd4   : > { %v254_v20 = vadd.f32 %v253_v19, %v252_v17 }
  0xd6   : > { %370 = vpush %v254_v20 }
 0x103   : > { %s369_s20 = spop %368 }
 0x104   : > { %v244_v23 = vstv %s369_s20 }
 0x105   : > { %v245_v24 = vadd.f32 1.0, %v244_v23 }
 0x107   : > { %s371_s30 = spop %370 }
 0x108   : > { %v256_v21 = vstv %s371_s30 }
 0x109   : > { %v257_v22 = vadd.f32 1.0, %v256_v21 }
 0x10b   : > { %432 = vrcp.f32 %v257_v22 }
 0x118   : > { %v433_v25 = vpop.eup %432 }
 0x119   : > { %v259_v26 = vmul.f32 %v433_v25, %v245_v24 }
 0x11b   : > { %v260_v27 = vsub.f32 1.0, %v259_v26 }
 0x11d   : > { %262 = vst.msk [vmem:[%s211_s17] sm:$0x1] %vm261_vm0, %v260_v27 }
 0x11e PF: > { %s18_s14 = sadd.s32 1, %s544_s14   ;;  %s698_s9 = smov %s528_s10 }
 0x11f   : > { %p15_p9 = scmp.ge.s32.totalorder %s18_s14, 4   ;;  %s699_s10 = smov %s532_s11 }
 0x120   : > { %s700_s11 = smov %s612_s21  ;;  %s701_s12 = smov %s540_s13 }
 0x121   : > { %s702_s13 = smov %s704_s16  ;;  %17 = sbr.rel (!%p15_p9) target bundleno = 6 (0x6), region = 89 }
 0x126   :  { %280 = vsyncpa [#allocation5], 1 }
 0x127   :  { %282 = vsyncpa [#allocation5 + $0x1], 1 }
 0x128   :  { %283 = vsyncpa [#allocation7], 1 }
 0x129   :  { %285 = vsyncpa [#allocation7 + $0x1], 1 }

</bundles_post_ra>
